<compile_context>
chip_gen: v7x
topology: tpu7x:2x2x1
jax: 0.10.0
libtpu: 0.0.40
codegen_flags: <defaults>
</compile_context>

<pallas_src>
import functools

import jax
import jax.numpy as jnp
from jax.experimental import pallas as pl
from jax.experimental.pallas import tpu as pltpu


def _round_up(x, m):
    return ((x + m - 1) // m) * m


def _linear_kernel(x_ref, w_ref, b_ref, o_ref, *, compute_dtype):
    # x_ref: (tm, K) f32   w_ref: (K, tn) bf16   b_ref: (1, tn) f32   o_ref: (tm, tn) f32
    x = x_ref[...].astype(compute_dtype)        # in-kernel cast: no wrapper astype op
    acc = jnp.dot(x, w_ref[...], preferred_element_type=jnp.float32)
    o_ref[...] = (acc + b_ref[...]).astype(o_ref.dtype)


def prepare_linear_params(weight, bias=None, *, compute_dtype=jnp.bfloat16):
    """One-time parameter prep (call at init, NOT per forward).

    weight: (out, in) PyTorch-convention matrix; bias: (out,) or None.
    Returns (w_kn, b_1n, n_out): weight transposed to (in, out_pad) in
    compute_dtype and bias as a (1, out_pad) f32 row, out_pad = round_up(out, 128).
    """
    n_out, k = weight.shape
    n_pad = _round_up(n_out, 128)
    w_kn = jnp.asarray(weight, compute_dtype).T                    # (K, N)
    if n_pad != n_out:
        w_kn = jnp.pad(w_kn, ((0, 0), (0, n_pad - n_out)))
    if bias is None:
        b_1n = jnp.zeros((1, n_pad), jnp.float32)
    else:
        b_1n = jnp.asarray(bias, jnp.float32).reshape(1, n_out)
        if n_pad != n_out:
            b_1n = jnp.pad(b_1n, ((0, 0), (0, n_pad - n_out)))
    return w_kn, b_1n, n_out


def pallas_linear(x, w_kn, b_1n, n_out, *, tm_max=256, tn_pref=512):
    """y = x @ W^T + b.  x: (M, K) f32; w_kn/b_1n from prepare_linear_params."""
    m, k = x.shape
    k_w, n_pad = w_kn.shape
    assert k == k_w, "input_size mismatch"
    assert n_pad % 128 == 0, "padded output width must be lane-aligned"

    compute_dtype = w_kn.dtype

    # --- M tiling: f32 activation tile, sublane multiple of 8, <= tm_max rows --
    tm = min(_round_up(m, 8), _round_up(tm_max, 8))
    m_pad = _round_up(m, tm)

    # --- N tiling: lane-dense tiles that evenly divide the padded width -------
    tn = min(tn_pref, n_pad)
    while n_pad % tn != 0:
        tn -= 128

    x_f32 = jnp.asarray(x, jnp.float32)
    if m_pad != m:
        x_f32 = jnp.pad(x_f32, ((0, m_pad - m), (0, 0)))

    grid = (m_pad // tm, n_pad // tn)

    kernel = functools.partial(_linear_kernel, compute_dtype=compute_dtype)

    out = pl.pallas_call(
        kernel,
        out_shape=jax.ShapeDtypeStruct((m_pad, n_pad), jnp.float32),
        grid_spec=pltpu.PrefetchScalarGridSpec(
            num_scalar_prefetch=0,
            grid=grid,
            in_specs=[
                pl.BlockSpec((tm, k), lambda i, j: (i, 0)),    # activation row-block
                pl.BlockSpec((k, tn), lambda i, j: (0, j)),    # weight col-block
                pl.BlockSpec((1, tn), lambda i, j: (0, j)),    # bias col-block
            ],
            out_specs=pl.BlockSpec((tm, tn), lambda i, j: (i, j)),
        ),
        compiler_params=pltpu.CompilerParams(
            dimension_semantics=("parallel", "parallel"),
        ),
    )(x_f32, w_kn, b_1n)

    # Strip M / N padding back to the logical shape.
    return out[:m, :n_out]


if __name__ == "__main__":
    # Module defaults: input_size=512, output_size=1000, bias=True.
    input_size, output_size = 512, 1000
    batch = 8

    key = jax.random.PRNGKey(0)
    kx, kw, kb = jax.random.split(key, 3)

    x = jax.random.normal(kx, (batch, input_size), dtype=jnp.float32)
    bound = 1.0 / (input_size ** 0.5)
    weight = jax.random.uniform(kw, (output_size, input_size),
                                minval=-bound, maxval=bound, dtype=jnp.float32)
    bias = jax.random.uniform(kb, (output_size,),
                              minval=-bound, maxval=bound, dtype=jnp.float32)

    # One-time prep (transpose + pad-to-128 + bf16 cast) -- off the hot path.
    w_kn, b_1n, n_out = prepare_linear_params(weight, bias,
                                              compute_dtype=jnp.bfloat16)

    fwd = jax.jit(lambda xx: pallas_linear(xx, w_kn, b_1n, n_out))
    y = fwd(x)
    jax.block_until_ready(y)
    assert y.shape == (batch, output_size)

    # Reference with the same bf16 quantization (kernel accumulates in f32).
    xq = x.astype(jnp.bfloat16).astype(jnp.float32)
    wq = weight.astype(jnp.bfloat16).astype(jnp.float32)
    y_q = xq @ wq.T + bias
    assert jnp.allclose(y, y_q, atol=2e-3, rtol=2e-3), \
        float(jnp.max(jnp.abs(y - y_q)))

    # And against the exact f32 module forward, at bf16-appropriate tolerance.
    y_ref = x @ weight.T + bias
    assert jnp.allclose(y, y_ref, atol=5e-2, rtol=5e-2), \
        float(jnp.max(jnp.abs(y - y_ref)))

    print("KERNEL_OK")
</pallas_src>

<mosaic_0001>
module attributes {stable_mosaic.version = 11 : i64} {
  func.func @_linear_kernel(%arg0: i32, %arg1: i32, %arg2: memref<8x512xf32, #tpu.memory_space<vmem>>, %arg3: memref<512x512xbf16, #tpu.memory_space<vmem>>, %arg4: memref<1x512xf32, #tpu.memory_space<vmem>>, %arg5: memref<8x512xf32, #tpu.memory_space<vmem>>) attributes {dimension_semantics = [#tpu.dimension_semantics<parallel>, #tpu.dimension_semantics<parallel>], iteration_bounds = array<i64: 1, 2>, scalar_prefetch = 0 : i64, scratch_operands = 0 : i64, tpu.core_type = #tpu.core_type<tc>, window_params = [{transform_indices = @transform_0, window_bounds = array<i64: 8, 512>}, {transform_indices = @transform_1, window_bounds = array<i64: 512, 512>}, {transform_indices = @transform_2, window_bounds = array<i64: 1, 512>}, {transform_indices = @transform_3, window_bounds = array<i64: 8, 512>}]} {
    %c0 = arith.constant 0 : index
    %c0_0 = arith.constant 0 : index
    %0 = vector.load %arg2[%c0, %c0_0] : memref<8x512xf32, #tpu.memory_space<vmem>>, vector<8x512xf32>
    %1 = arith.truncf %0 : vector<8x512xf32> to vector<8x512xbf16>
    %c0_1 = arith.constant 0 : index
    %c0_2 = arith.constant 0 : index
    %2 = vector.load %arg3[%c0_1, %c0_2] : memref<512x512xbf16, #tpu.memory_space<vmem>>, vector<512x512xbf16>
    %cst = arith.constant dense<0.000000e+00> : vector<8x512xf32>
    %3 = tpu.matmul %1, %2, %cst {dimension_numbers = #tpu.dot_dimension_numbers<[1], [0], [0], [1], [0, 0, 1, 1], [], []>} : vector<8x512xbf16>, vector<512x512xbf16>, vector<8x512xf32> -> vector<8x512xf32>
    %c0_3 = arith.constant 0 : index
    %c0_4 = arith.constant 0 : index
    %4 = vector.load %arg4[%c0_3, %c0_4] : memref<1x512xf32, #tpu.memory_space<vmem>>, vector<1x512xf32>
    %5 = vector.broadcast %4 : vector<1x512xf32> to vector<8x512xf32>
    %6 = arith.addf %3, %5 : vector<8x512xf32>
    %c0_5 = arith.constant 0 : index
    %c0_6 = arith.constant 0 : index
    %7 = vector.load %arg5[%c0_5, %c0_6] : memref<8x512xf32, #tpu.memory_space<vmem>>, vector<8x512xf32>
    tpu.vector_store %arg5[%c0_5, %c0_6], %6 {strides = array<i32>} : memref<8x512xf32, #tpu.memory_space<vmem>>, vector<8x512xf32>,
    return
  }
  func.func @transform_0(%arg0: i32, %arg1: i32) -> (i32, i32) {
    %c0_i32 = arith.constant 0 : i32
    %c0_i32_0 = arith.constant 0 : i32
    return %arg0, %c0_i32 : i32, i32
  }
  func.func @transform_1(%arg0: i32, %arg1: i32) -> (i32, i32) {
    %c0_i32 = arith.constant 0 : i32
    %c0_i32_0 = arith.constant 0 : i32
    return %c0_i32, %arg1 : i32, i32
  }
  func.func @transform_2(%arg0: i32, %arg1: i32) -> (i32, i32) {
    %c0_i32 = arith.constant 0 : i32
    %c0_i32_0 = arith.constant 0 : i32
    return %c0_i32, %arg1 : i32, i32
  }
  func.func @transform_3(%arg0: i32, %arg1: i32) -> (i32, i32) {
    %c0_i32 = arith.constant 0 : i32
    return %arg0, %arg1 : i32, i32
  }
}

</mosaic_0001>

<bundles_post_ra>
// kernel: _lambda_.1
= control target key start
LH: loop header
LB: loop body
LE: loop exit
PB: predicated region body
PF: predicated region fallthrough
CT: control target
= control target key end

     0   :  { %8 = vsyncpa [#allocation4], 0  ;;  %s2616_s0 = inlined_call_operand.vmem [shape: f32[8,512], index: 0, kind: input, shape index: {}]   ;;  %s2617_s1 = inlined_call_operand.vmem [shape: bf16[512,1024], index: 1, kind: input, shape index: {}]   ;;  %s2618_s2 = inlined_call_operand.vmem [shape: f32[1,1024], index: 2, kind: input, shape index: {}]   ;;  %s2619_s3 = inlined_call_operand.hbm [shape: f32[8,1024], index: 3, kind: output, shape index: {}]  }
   0x1   :  { %10 = vsyncpa [#allocation4 + $0x1], 0  ;;  %s2088_s12 = smov 0   ;;  %s2090_s13 = smov 0  }
   0x2   :  { %s2092_s14 = smov 0   ;;  %s2094_s15 = smov 0  }
   0x3   :  { %s2096_s16 = smov 0   ;;  %s2098_s17 = smov 0  }
   0x4 LB: > { %s1581_s18 = sadd.s32 4294967295, %s2065_s17   ;;  %s1582_s19 = sadd.s32 4294967294, %s2065_s17   ;;  %s2065_s17 = sphi %s2098_s17, %s16_s17   ;;  %s2061_s16 = sphi %s2096_s16, %s2626_s16   ;;  %s2057_s15 = sphi %s2094_s15, %s2625_s15   ;;  %s2053_s14 = sphi %s2092_s14, %s2624_s14   ;;  %s2049_s13 = sphi %s2090_s13, %s2623_s13   ;;  %s2045_s12 = sphi %s2088_s12, %s2622_s12  }
   0x5   : > { %s25_s20 = sadd.s32 1, %s2061_s16  ;;  %s61_s21 = sadd.s32 1, %s2053_s14 }
   0x6   : > { %p26_p0 = scmp.ge.s32.totalorder %s25_s20, 2  ;;  %p68_p1 = scmp.ne.s32.totalorder %s2053_s14, %s2049_s13 }
   0x7   : > { %p69_p2 = scmp.eq.s32.totalorder %s2065_s17, 0  ;;  %p126_p3 = scmp.eq.s32.totalorder %s1581_s18, 1 }
   0x8   : > { %s2628_s20 = smov (%p26_p0, %s25_s20), 0  ;;  %p131_p6 = scmp.ne.s32.totalorder %s2049_s13, %s2045_s12 }
   0x9   : > { %p70_p4 = por %p69_p2, %p68_p1  ;;  %p2127_p5 = por %p126_p3, %p68_p1 }
   0xa   : > { %s58_s23 = ssub.s32 %s2061_s16, %s2628_s20  ;;  %p132_p8 = scmp.eq.s32.totalorder %s1582_s19, 1 }
   0xb   : > { %p59_p7 = scmp.eq.s32.totalorder %s58_s23, 0  ;;  %p1585_p10 = scmp.ge.s32.totalorder %s2065_s17, 2 }
   0xc   : > { %p2138_p9 = por %p132_p8, %p131_p6 }
   0xd   : > { %s2136_s24 = scalar_select %p59_p7, %s2053_s14, %s61_s21  }
   0xe   : > { %156 = sbr.rel (%p1585_p10) target bundleno = 89 (0x59), region = 20 }
  0x15   : > { %159 = sbr.rel (!%p70_p4) target bundleno = 89 (0x59), region = 24  ;;  %s161_s26 = sand.u32 (%p70_p4), 1, %s2053_s14  }
  0x16   : > { %s1726_s27 = sshll.u32 (%p70_p4), %s2061_s16, 4  ;;  %s1586_s28 = sshll.u32 (%p70_p4), %s161_s26, 10 }
  0x17   : > { %s2150_s4 = scalar_lea.vmem (%p70_p4), %s2617_s1, %s1726_s27  ;;  %s2155_s5 = scalar_lea.vmem (%p70_p4), [#allocation2], %s1586_s28 }
  0x18   : > { %v179_v0 = vld [vmem:[%s2150_s4] sm:$0xff] (%p70_p4)  ;;  %v181_v1 = vld [vmem:[%s2150_s4 + $0x8] sm:$0xff] (%p70_p4) }
  0x19   : > { %v183_v2 = vld [vmem:[%s2150_s4 + $0x20] sm:$0xff] (%p70_p4)  ;;  %180 = vst [vmem:[%s2155_s5] sm:$0xff] (%p70_p4), %v179_v0  ;;  %182 = vst [vmem:[%s2155_s5 + $0x8] sm:$0xff] (%p70_p4), %v181_v1  ;;  %v185_v3 = vld [vmem:[%s2150_s4 + $0x28] sm:$0xff] (%p70_p4) }
  0x1a   : > { %184 = vst [vmem:[%s2155_s5 + $0x10] sm:$0xff] (%p70_p4), %v183_v2  ;;  %v187_v4 = vld [vmem:[%s2150_s4 + $0x40] sm:$0xff] (%p70_p4)  ;;  %v189_v5 = vld [vmem:[%s2150_s4 + $0x48] sm:$0xff] (%p70_p4)  ;;  %186 = vst [vmem:[%s2155_s5 + $0x18] sm:$0xff] (%p70_p4), %v185_v3 }
  0x1b   : > { %188 = vst [vmem:[%s2155_s5 + $0x20] sm:$0xff] (%p70_p4), %v187_v4  ;;  %190 = vst [vmem:[%s2155_s5 + $0x28] sm:$0xff] (%p70_p4), %v189_v5  ;;  %v191_v6 = vld [vmem:[%s2150_s4 + $0x60] sm:$0xff] (%p70_p4)  ;;  %v193_v7 = vld [vmem:[%s2150_s4 + $0x68] sm:$0xff] (%p70_p4) }
  0x1c   : > { %v195_v8 = vld [vmem:[%s2150_s4 + $0x80] sm:$0xff]  ;;  %192 = vst [vmem:[%s2155_s5 + $0x30] sm:$0xff] %v191_v6  ;;  %194 = vst [vmem:[%s2155_s5 + $0x38] sm:$0xff] %v193_v7  ;;  %v197_v9 = vld [vmem:[%s2150_s4 + $0x88] sm:$0xff] }
  0x1d   : > { %196 = vst [vmem:[%s2155_s5 + $0x40] sm:$0xff] %v195_v8  ;;  %v199_v10 = vld [vmem:[%s2150_s4 + $0xa0] sm:$0xff]  ;;  %v201_v11 = vld [vmem:[%s2150_s4 + $0xa8] sm:$0xff]  ;;  %198 = vst [vmem:[%s2155_s5 + $0x48] sm:$0xff] %v197_v9 }
  0x1e   : > { %200 = vst [vmem:[%s2155_s5 + $0x50] sm:$0xff] %v199_v10  ;;  %202 = vst [vmem:[%s2155_s5 + $0x58] sm:$0xff] %v201_v11  ;;  %v203_v12 = vld [vmem:[%s2150_s4 + $0xc0] sm:$0xff]  ;;  %v205_v13 = vld [vmem:[%s2150_s4 + $0xc8] sm:$0xff] }
  0x1f   : > { %v207_v14 = vld [vmem:[%s2150_s4 + $0xe0] sm:$0xff]  ;;  %204 = vst [vmem:[%s2155_s5 + $0x60] sm:$0xff] %v203_v12  ;;  %206 = vst [vmem:[%s2155_s5 + $0x68] sm:$0xff] %v205_v13  ;;  %v209_v15 = vld [vmem:[%s2150_s4 + $0xe8] sm:$0xff] }
  0x20   : > { %208 = vst [vmem:[%s2155_s5 + $0x70] sm:$0xff] %v207_v14  ;;  %v211_v16 = vld [vmem:[%s2150_s4 + $0x100] sm:$0xff]  ;;  %v213_v17 = vld [vmem:[%s2150_s4 + $0x108] sm:$0xff]  ;;  %210 = vst [vmem:[%s2155_s5 + $0x78] sm:$0xff] %v209_v15 }
  0x21   : > { %212 = vst [vmem:[%s2155_s5 + $0x80] sm:$0xff] %v211_v16  ;;  %214 = vst [vmem:[%s2155_s5 + $0x88] sm:$0xff] %v213_v17  ;;  %v215_v18 = vld [vmem:[%s2150_s4 + $0x120] sm:$0xff]  ;;  %v217_v19 = vld [vmem:[%s2150_s4 + $0x128] sm:$0xff] }
  0x22   : > { %v219_v20 = vld [vmem:[%s2150_s4 + $0x140] sm:$0xff]  ;;  %216 = vst [vmem:[%s2155_s5 + $0x90] sm:$0xff] %v215_v18  ;;  %218 = vst [vmem:[%s2155_s5 + $0x98] sm:$0xff] %v217_v19  ;;  %v221_v21 = vld [vmem:[%s2150_s4 + $0x148] sm:$0xff] }
  0x23   : > { %220 = vst [vmem:[%s2155_s5 + $0xa0] sm:$0xff] %v219_v20  ;;  %v223_v22 = vld [vmem:[%s2150_s4 + $0x160] sm:$0xff]  ;;  %v225_v23 = vld [vmem:[%s2150_s4 + $0x168] sm:$0xff]  ;;  %222 = vst [vmem:[%s2155_s5 + $0xa8] sm:$0xff] %v221_v21 }
  0x24   : > { %224 = vst [vmem:[%s2155_s5 + $0xb0] sm:$0xff] %v223_v22  ;;  %226 = vst [vmem:[%s2155_s5 + $0xb8] sm:$0xff] %v225_v23  ;;  %v227_v24 = vld [vmem:[%s2150_s4 + $0x180] sm:$0xff]  ;;  %v229_v25 = vld [vmem:[%s2150_s4 + $0x188] sm:$0xff] }
  0x25   : > { %v231_v26 = vld [vmem:[%s2150_s4 + $0x1a0] sm:$0xff]  ;;  %228 = vst [vmem:[%s2155_s5 + $0xc0] sm:$0xff] %v227_v24  ;;  %230 = vst [vmem:[%s2155_s5 + $0xc8] sm:$0xff] %v229_v25  ;;  %v233_v27 = vld [vmem:[%s2150_s4 + $0x1a8] sm:$0xff] }
  0x26   : > { %232 = vst [vmem:[%s2155_s5 + $0xd0] sm:$0xff] %v231_v26  ;;  %v235_v28 = vld [vmem:[%s2150_s4 + $0x1c0] sm:$0xff]  ;;  %v237_v29 = vld [vmem:[%s2150_s4 + $0x1c8] sm:$0xff]  ;;  %234 = vst [vmem:[%s2155_s5 + $0xd8] sm:$0xff] %v233_v27 }
  0x27   : > { %236 = vst [vmem:[%s2155_s5 + $0xe0] sm:$0xff] %v235_v28  ;;  %238 = vst [vmem:[%s2155_s5 + $0xe8] sm:$0xff] %v237_v29  ;;  %v239_v30 = vld [vmem:[%s2150_s4 + $0x1e0] sm:$0xff]  ;;  %v241_v31 = vld [vmem:[%s2150_s4 + $0x1e8] sm:$0xff] }
  0x28   : > { %v243_v32 = vld [vmem:[%s2150_s4 + $0x200] sm:$0xff]  ;;  %240 = vst [vmem:[%s2155_s5 + $0xf0] sm:$0xff] %v239_v30  ;;  %242 = vst [vmem:[%s2155_s5 + $0xf8] sm:$0xff] %v241_v31  ;;  %v245_v33 = vld [vmem:[%s2150_s4 + $0x208] sm:$0xff] }
  0x29   : > { %244 = vst [vmem:[%s2155_s5 + $0x100] sm:$0xff] %v243_v32  ;;  %v247_v34 = vld [vmem:[%s2150_s4 + $0x220] sm:$0xff]  ;;  %v249_v35 = vld [vmem:[%s2150_s4 + $0x228] sm:$0xff]  ;;  %246 = vst [vmem:[%s2155_s5 + $0x108] sm:$0xff] %v245_v33 }
  0x2a   : > { %248 = vst [vmem:[%s2155_s5 + $0x110] sm:$0xff] %v247_v34  ;;  %250 = vst [vmem:[%s2155_s5 + $0x118] sm:$0xff] %v249_v35  ;;  %v251_v36 = vld [vmem:[%s2150_s4 + $0x240] sm:$0xff]  ;;  %v253_v37 = vld [vmem:[%s2150_s4 + $0x248] sm:$0xff] }
  0x2b   : > { %v255_v38 = vld [vmem:[%s2150_s4 + $0x260] sm:$0xff]  ;;  %252 = vst [vmem:[%s2155_s5 + $0x120] sm:$0xff] %v251_v36  ;;  %254 = vst [vmem:[%s2155_s5 + $0x128] sm:$0xff] %v253_v37  ;;  %v257_v39 = vld [vmem:[%s2150_s4 + $0x268] sm:$0xff] }
  0x2c   : > { %256 = vst [vmem:[%s2155_s5 + $0x130] sm:$0xff] %v255_v38  ;;  %v259_v40 = vld [vmem:[%s2150_s4 + $0x280] sm:$0xff]  ;;  %v261_v41 = vld [vmem:[%s2150_s4 + $0x288] sm:$0xff]  ;;  %258 = vst [vmem:[%s2155_s5 + $0x138] sm:$0xff] %v257_v39 }
  0x2d   : > { %260 = vst [vmem:[%s2155_s5 + $0x140] sm:$0xff] %v259_v40  ;;  %262 = vst [vmem:[%s2155_s5 + $0x148] sm:$0xff] %v261_v41  ;;  %v263_v42 = vld [vmem:[%s2150_s4 + $0x2a0] sm:$0xff]  ;;  %v265_v43 = vld [vmem:[%s2150_s4 + $0x2a8] sm:$0xff] }
  0x2e   : > { %v267_v44 = vld [vmem:[%s2150_s4 + $0x2c0] sm:$0xff]  ;;  %264 = vst [vmem:[%s2155_s5 + $0x150] sm:$0xff] %v263_v42  ;;  %266 = vst [vmem:[%s2155_s5 + $0x158] sm:$0xff] %v265_v43  ;;  %v269_v45 = vld [vmem:[%s2150_s4 + $0x2c8] sm:$0xff] }
  0x2f   : > { %268 = vst [vmem:[%s2155_s5 + $0x160] sm:$0xff] %v267_v44  ;;  %v271_v46 = vld [vmem:[%s2150_s4 + $0x2e0] sm:$0xff]  ;;  %v273_v47 = vld [vmem:[%s2150_s4 + $0x2e8] sm:$0xff]  ;;  %270 = vst [vmem:[%s2155_s5 + $0x168] sm:$0xff] %v269_v45 }
  0x30   : > { %272 = vst [vmem:[%s2155_s5 + $0x170] sm:$0xff] %v271_v46  ;;  %274 = vst [vmem:[%s2155_s5 + $0x178] sm:$0xff] %v273_v47  ;;  %v275_v48 = vld [vmem:[%s2150_s4 + $0x300] sm:$0xff]  ;;  %v277_v49 = vld [vmem:[%s2150_s4 + $0x308] sm:$0xff] }
  0x31   : > { %v279_v50 = vld [vmem:[%s2150_s4 + $0x320] sm:$0xff]  ;;  %276 = vst [vmem:[%s2155_s5 + $0x180] sm:$0xff] %v275_v48  ;;  %278 = vst [vmem:[%s2155_s5 + $0x188] sm:$0xff] %v277_v49  ;;  %v281_v51 = vld [vmem:[%s2150_s4 + $0x328] sm:$0xff] }
  0x32   : > { %280 = vst [vmem:[%s2155_s5 + $0x190] sm:$0xff] %v279_v50  ;;  %v283_v52 = vld [vmem:[%s2150_s4 + $0x340] sm:$0xff]  ;;  %v285_v53 = vld [vmem:[%s2150_s4 + $0x348] sm:$0xff]  ;;  %282 = vst [vmem:[%s2155_s5 + $0x198] sm:$0xff] %v281_v51 }
  0x33   : > { %284 = vst [vmem:[%s2155_s5 + $0x1a0] sm:$0xff] %v283_v52  ;;  %286 = vst [vmem:[%s2155_s5 + $0x1a8] sm:$0xff] %v285_v53  ;;  %v287_v54 = vld [vmem:[%s2150_s4 + $0x360] sm:$0xff]  ;;  %v289_v55 = vld [vmem:[%s2150_s4 + $0x368] sm:$0xff] }
  0x34   : > { %v291_v56 = vld [vmem:[%s2150_s4 + $0x380] sm:$0xff]  ;;  %288 = vst [vmem:[%s2155_s5 + $0x1b0] sm:$0xff] %v287_v54  ;;  %290 = vst [vmem:[%s2155_s5 + $0x1b8] sm:$0xff] %v289_v55  ;;  %v293_v57 = vld [vmem:[%s2150_s4 + $0x388] sm:$0xff] }
  0x35   : > { %292 = vst [vmem:[%s2155_s5 + $0x1c0] sm:$0xff] %v291_v56  ;;  %v295_v58 = vld [vmem:[%s2150_s4 + $0x3a0] sm:$0xff]  ;;  %v297_v59 = vld [vmem:[%s2150_s4 + $0x3a8] sm:$0xff]  ;;  %294 = vst [vmem:[%s2155_s5 + $0x1c8] sm:$0xff] %v293_v57 }
  0x36   : > { %296 = vst [vmem:[%s2155_s5 + $0x1d0] sm:$0xff] %v295_v58  ;;  %298 = vst [vmem:[%s2155_s5 + $0x1d8] sm:$0xff] %v297_v59  ;;  %v299_v60 = vld [vmem:[%s2150_s4 + $0x3c0] sm:$0xff]  ;;  %v301_v61 = vld [vmem:[%s2150_s4 + $0x3c8] sm:$0xff] }
  0x37   : > { %v303_v62 = vld [vmem:[%s2150_s4 + $0x3e0] sm:$0xff]  ;;  %300 = vst [vmem:[%s2155_s5 + $0x1e0] sm:$0xff] %v299_v60  ;;  %302 = vst [vmem:[%s2155_s5 + $0x1e8] sm:$0xff] %v301_v61  ;;  %v305_v63 = vld [vmem:[%s2150_s4 + $0x3e8] sm:$0xff] }
  0x38   : > { %304 = vst [vmem:[%s2155_s5 + $0x1f0] sm:$0xff] %v303_v62  ;;  %v307_v0 = vld [vmem:[%s2150_s4 + $0x400] sm:$0xff]  ;;  %v309_v1 = vld [vmem:[%s2150_s4 + $0x408] sm:$0xff]  ;;  %306 = vst [vmem:[%s2155_s5 + $0x1f8] sm:$0xff] %v305_v63 }
  0x39   : > { %308 = vst [vmem:[%s2155_s5 + $0x200] sm:$0xff] %v307_v0  ;;  %310 = vst [vmem:[%s2155_s5 + $0x208] sm:$0xff] %v309_v1  ;;  %v311_v2 = vld [vmem:[%s2150_s4 + $0x420] sm:$0xff]  ;;  %v313_v3 = vld [vmem:[%s2150_s4 + $0x428] sm:$0xff] }
  0x3a   : > { %v315_v4 = vld [vmem:[%s2150_s4 + $0x440] sm:$0xff]  ;;  %312 = vst [vmem:[%s2155_s5 + $0x210] sm:$0xff] %v311_v2  ;;  %314 = vst [vmem:[%s2155_s5 + $0x218] sm:$0xff] %v313_v3  ;;  %v317_v5 = vld [vmem:[%s2150_s4 + $0x448] sm:$0xff] }
  0x3b   : > { %316 = vst [vmem:[%s2155_s5 + $0x220] sm:$0xff] %v315_v4  ;;  %v319_v6 = vld [vmem:[%s2150_s4 + $0x460] sm:$0xff]  ;;  %v321_v7 = vld [vmem:[%s2150_s4 + $0x468] sm:$0xff]  ;;  %318 = vst [vmem:[%s2155_s5 + $0x228] sm:$0xff] %v317_v5 }
  0x3c   : > { %320 = vst [vmem:[%s2155_s5 + $0x230] sm:$0xff] %v319_v6  ;;  %322 = vst [vmem:[%s2155_s5 + $0x238] sm:$0xff] %v321_v7  ;;  %v323_v8 = vld [vmem:[%s2150_s4 + $0x480] sm:$0xff]  ;;  %v325_v9 = vld [vmem:[%s2150_s4 + $0x488] sm:$0xff] }
  0x3d   : > { %v327_v10 = vld [vmem:[%s2150_s4 + $0x4a0] sm:$0xff]  ;;  %324 = vst [vmem:[%s2155_s5 + $0x240] sm:$0xff] %v323_v8  ;;  %326 = vst [vmem:[%s2155_s5 + $0x248] sm:$0xff] %v325_v9  ;;  %v329_v11 = vld [vmem:[%s2150_s4 + $0x4a8] sm:$0xff] }
  0x3e   : > { %328 = vst [vmem:[%s2155_s5 + $0x250] sm:$0xff] %v327_v10  ;;  %v331_v12 = vld [vmem:[%s2150_s4 + $0x4c0] sm:$0xff]  ;;  %v333_v13 = vld [vmem:[%s2150_s4 + $0x4c8] sm:$0xff]  ;;  %330 = vst [vmem:[%s2155_s5 + $0x258] sm:$0xff] %v329_v11 }
  0x3f   : > { %332 = vst [vmem:[%s2155_s5 + $0x260] sm:$0xff] %v331_v12  ;;  %334 = vst [vmem:[%s2155_s5 + $0x268] sm:$0xff] %v333_v13  ;;  %v335_v14 = vld [vmem:[%s2150_s4 + $0x4e0] sm:$0xff]  ;;  %v337_v15 = vld [vmem:[%s2150_s4 + $0x4e8] sm:$0xff] }
  0x40   : > { %v339_v16 = vld [vmem:[%s2150_s4 + $0x500] sm:$0xff]  ;;  %336 = vst [vmem:[%s2155_s5 + $0x270] sm:$0xff] %v335_v14  ;;  %338 = vst [vmem:[%s2155_s5 + $0x278] sm:$0xff] %v337_v15  ;;  %v341_v17 = vld [vmem:[%s2150_s4 + $0x508] sm:$0xff] }
  0x41   : > { %340 = vst [vmem:[%s2155_s5 + $0x280] sm:$0xff] %v339_v16  ;;  %v343_v18 = vld [vmem:[%s2150_s4 + $0x520] sm:$0xff]  ;;  %v345_v19 = vld [vmem:[%s2150_s4 + $0x528] sm:$0xff]  ;;  %342 = vst [vmem:[%s2155_s5 + $0x288] sm:$0xff] %v341_v17 }
  0x42   : > { %344 = vst [vmem:[%s2155_s5 + $0x290] sm:$0xff] %v343_v18  ;;  %346 = vst [vmem:[%s2155_s5 + $0x298] sm:$0xff] %v345_v19  ;;  %v347_v20 = vld [vmem:[%s2150_s4 + $0x540] sm:$0xff]  ;;  %v349_v21 = vld [vmem:[%s2150_s4 + $0x548] sm:$0xff] }
  0x43   : > { %v351_v22 = vld [vmem:[%s2150_s4 + $0x560] sm:$0xff]  ;;  %348 = vst [vmem:[%s2155_s5 + $0x2a0] sm:$0xff] %v347_v20  ;;  %350 = vst [vmem:[%s2155_s5 + $0x2a8] sm:$0xff] %v349_v21  ;;  %v353_v23 = vld [vmem:[%s2150_s4 + $0x568] sm:$0xff] }
  0x44   : > { %352 = vst [vmem:[%s2155_s5 + $0x2b0] sm:$0xff] %v351_v22  ;;  %v355_v24 = vld [vmem:[%s2150_s4 + $0x580] sm:$0xff]  ;;  %v357_v25 = vld [vmem:[%s2150_s4 + $0x588] sm:$0xff]  ;;  %354 = vst [vmem:[%s2155_s5 + $0x2b8] sm:$0xff] %v353_v23 }
  0x45   : > { %356 = vst [vmem:[%s2155_s5 + $0x2c0] sm:$0xff] %v355_v24  ;;  %358 = vst [vmem:[%s2155_s5 + $0x2c8] sm:$0xff] %v357_v25  ;;  %v359_v26 = vld [vmem:[%s2150_s4 + $0x5a0] sm:$0xff]  ;;  %v361_v27 = vld [vmem:[%s2150_s4 + $0x5a8] sm:$0xff] }
  0x46   : > { %v363_v28 = vld [vmem:[%s2150_s4 + $0x5c0] sm:$0xff]  ;;  %360 = vst [vmem:[%s2155_s5 + $0x2d0] sm:$0xff] %v359_v26  ;;  %362 = vst [vmem:[%s2155_s5 + $0x2d8] sm:$0xff] %v361_v27  ;;  %v365_v29 = vld [vmem:[%s2150_s4 + $0x5c8] sm:$0xff] }
  0x47   : > { %364 = vst [vmem:[%s2155_s5 + $0x2e0] sm:$0xff] %v363_v28  ;;  %v367_v30 = vld [vmem:[%s2150_s4 + $0x5e0] sm:$0xff]  ;;  %v369_v31 = vld [vmem:[%s2150_s4 + $0x5e8] sm:$0xff]  ;;  %366 = vst [vmem:[%s2155_s5 + $0x2e8] sm:$0xff] %v365_v29 }
  0x48   : > { %368 = vst [vmem:[%s2155_s5 + $0x2f0] sm:$0xff] %v367_v30  ;;  %370 = vst [vmem:[%s2155_s5 + $0x2f8] sm:$0xff] %v369_v31  ;;  %v371_v32 = vld [vmem:[%s2150_s4 + $0x600] sm:$0xff]  ;;  %v373_v33 = vld [vmem:[%s2150_s4 + $0x608] sm:$0xff] }
  0x49   : > { %v375_v34 = vld [vmem:[%s2150_s4 + $0x620] sm:$0xff]  ;;  %372 = vst [vmem:[%s2155_s5 + $0x300] sm:$0xff] %v371_v32  ;;  %374 = vst [vmem:[%s2155_s5 + $0x308] sm:$0xff] %v373_v33  ;;  %v377_v35 = vld [vmem:[%s2150_s4 + $0x628] sm:$0xff] }
  0x4a   : > { %376 = vst [vmem:[%s2155_s5 + $0x310] sm:$0xff] %v375_v34  ;;  %v379_v36 = vld [vmem:[%s2150_s4 + $0x640] sm:$0xff]  ;;  %v381_v37 = vld [vmem:[%s2150_s4 + $0x648] sm:$0xff]  ;;  %378 = vst [vmem:[%s2155_s5 + $0x318] sm:$0xff] %v377_v35 }
  0x4b   : > { %380 = vst [vmem:[%s2155_s5 + $0x320] sm:$0xff] %v379_v36  ;;  %382 = vst [vmem:[%s2155_s5 + $0x328] sm:$0xff] %v381_v37  ;;  %v383_v38 = vld [vmem:[%s2150_s4 + $0x660] sm:$0xff]  ;;  %v385_v39 = vld [vmem:[%s2150_s4 + $0x668] sm:$0xff] }
  0x4c   : > { %v387_v40 = vld [vmem:[%s2150_s4 + $0x680] sm:$0xff]  ;;  %384 = vst [vmem:[%s2155_s5 + $0x330] sm:$0xff] %v383_v38  ;;  %386 = vst [vmem:[%s2155_s5 + $0x338] sm:$0xff] %v385_v39  ;;  %v389_v41 = vld [vmem:[%s2150_s4 + $0x688] sm:$0xff] }
  0x4d   : > { %388 = vst [vmem:[%s2155_s5 + $0x340] sm:$0xff] %v387_v40  ;;  %v391_v42 = vld [vmem:[%s2150_s4 + $0x6a0] sm:$0xff]  ;;  %v393_v43 = vld [vmem:[%s2150_s4 + $0x6a8] sm:$0xff]  ;;  %390 = vst [vmem:[%s2155_s5 + $0x348] sm:$0xff] %v389_v41 }
  0x4e   : > { %392 = vst [vmem:[%s2155_s5 + $0x350] sm:$0xff] %v391_v42  ;;  %394 = vst [vmem:[%s2155_s5 + $0x358] sm:$0xff] %v393_v43  ;;  %v395_v44 = vld [vmem:[%s2150_s4 + $0x6c0] sm:$0xff]  ;;  %v397_v45 = vld [vmem:[%s2150_s4 + $0x6c8] sm:$0xff] }
  0x4f   : > { %v399_v46 = vld [vmem:[%s2150_s4 + $0x6e0] sm:$0xff]  ;;  %396 = vst [vmem:[%s2155_s5 + $0x360] sm:$0xff] %v395_v44  ;;  %398 = vst [vmem:[%s2155_s5 + $0x368] sm:$0xff] %v397_v45  ;;  %v401_v47 = vld [vmem:[%s2150_s4 + $0x6e8] sm:$0xff] }
  0x50   : > { %400 = vst [vmem:[%s2155_s5 + $0x370] sm:$0xff] %v399_v46  ;;  %v403_v48 = vld [vmem:[%s2150_s4 + $0x700] sm:$0xff]  ;;  %v405_v49 = vld [vmem:[%s2150_s4 + $0x708] sm:$0xff]  ;;  %402 = vst [vmem:[%s2155_s5 + $0x378] sm:$0xff] %v401_v47 }
  0x51   : > { %404 = vst [vmem:[%s2155_s5 + $0x380] sm:$0xff] %v403_v48  ;;  %406 = vst [vmem:[%s2155_s5 + $0x388] sm:$0xff] %v405_v49  ;;  %v407_v50 = vld [vmem:[%s2150_s4 + $0x720] sm:$0xff]  ;;  %v409_v51 = vld [vmem:[%s2150_s4 + $0x728] sm:$0xff] }
  0x52   : > { %v411_v52 = vld [vmem:[%s2150_s4 + $0x740] sm:$0xff]  ;;  %408 = vst [vmem:[%s2155_s5 + $0x390] sm:$0xff] %v407_v50  ;;  %410 = vst [vmem:[%s2155_s5 + $0x398] sm:$0xff] %v409_v51  ;;  %v413_v53 = vld [vmem:[%s2150_s4 + $0x748] sm:$0xff] }
  0x53   : > { %412 = vst [vmem:[%s2155_s5 + $0x3a0] sm:$0xff] %v411_v52  ;;  %v415_v54 = vld [vmem:[%s2150_s4 + $0x760] sm:$0xff]  ;;  %v417_v55 = vld [vmem:[%s2150_s4 + $0x768] sm:$0xff]  ;;  %414 = vst [vmem:[%s2155_s5 + $0x3a8] sm:$0xff] %v413_v53 }
  0x54   : > { %416 = vst [vmem:[%s2155_s5 + $0x3b0] sm:$0xff] %v415_v54  ;;  %418 = vst [vmem:[%s2155_s5 + $0x3b8] sm:$0xff] %v417_v55  ;;  %v419_v56 = vld [vmem:[%s2150_s4 + $0x780] sm:$0xff]  ;;  %v421_v57 = vld [vmem:[%s2150_s4 + $0x788] sm:$0xff] }
  0x55   : > { %v423_v58 = vld [vmem:[%s2150_s4 + $0x7a0] sm:$0xff]  ;;  %420 = vst [vmem:[%s2155_s5 + $0x3c0] sm:$0xff] %v419_v56  ;;  %422 = vst [vmem:[%s2155_s5 + $0x3c8] sm:$0xff] %v421_v57  ;;  %v425_v59 = vld [vmem:[%s2150_s4 + $0x7a8] sm:$0xff] }
  0x56   : > { %424 = vst [vmem:[%s2155_s5 + $0x3d0] sm:$0xff] %v423_v58  ;;  %v427_v60 = vld [vmem:[%s2150_s4 + $0x7c0] sm:$0xff]  ;;  %v429_v61 = vld [vmem:[%s2150_s4 + $0x7c8] sm:$0xff]  ;;  %426 = vst [vmem:[%s2155_s5 + $0x3d8] sm:$0xff] %v425_v59 }
  0x57   : > { %428 = vst [vmem:[%s2155_s5 + $0x3e0] sm:$0xff] %v427_v60  ;;  %430 = vst [vmem:[%s2155_s5 + $0x3e8] sm:$0xff] %v429_v61  ;;  %v431_v62 = vld [vmem:[%s2150_s4 + $0x7e0] sm:$0xff]  ;;  %v433_v63 = vld [vmem:[%s2150_s4 + $0x7e8] sm:$0xff] }
  0x58   : > { %432 = vst [vmem:[%s2155_s5 + $0x3f0] sm:$0xff] %v431_v62  ;;  %434 = vst [vmem:[%s2155_s5 + $0x3f8] sm:$0xff] %v433_v63 }
  0x59 PF: > { %p1589_p11 = scmp.ge.s32.totalorder %s2065_s17, 1  ;;  %p447_p12 = scmp.lt.s32.totalorder %s2065_s17, 3 }
  0x5b   : > { %p448_p13 = pnand %p1589_p11, %p447_p12 }
  0x5c   : > { %s2413_s6 = sand.u32 (!%p448_p13), 1, %s2049_s13   ;;  %v499_v0 = vld [vmem:[%s2616_s0 + $0x8] sm:$0xff] (!%p448_p13)  ;;  %s1592_s27 = sshll.u32 (!%p448_p13), %s2057_s15, 2 }
  0x5d   : > { %451 = sbr.rel (%p448_p13) target bundleno = 453 (0x1c5), region = 51  ;;  %s1590_s9 = sshll.u32 (!%p448_p13), %s2413_s6, 10  ;;  %v503_v1 = vpack.c.bf16 (!%p448_p13), %v499_v0, %v499_v0  ;;  %v498_v0 = vld [vmem:[%s2616_s0] sm:$0xff] (!%p448_p13) }
  0x5e   : > { %s2419_s10 = scalar_lea.vmem (!%p448_p13), [#allocation2], %s1590_s9  ;;  %p493_p0 = scmp.lt.s32.totalorder (!%p448_p13), %s1592_s27, 7 }
  0x5f   : > { %v1795_v2 = vld [vmem:[%s2419_s10 + $0x4] ss:$16 sps:$4 sm:$0xff] (!%p448_p13)   ;;  %1328 = vmatprep.mubr.bf16.mxu0 (!%p448_p13), %v503_v1  ;;  %1410 = vmatprep.mubr.bf16.mxu1 (!%p448_p13), %v503_v1  ;;  %v1797_v3 = vld [vmem:[%s2419_s10 + $0xc] ss:$16 sps:$4 sm:$0xff] (!%p448_p13)   ;;  %v1799_v4 = vld [vmem:[%s2419_s10] ss:$16 sps:$4 sm:$0xff] (!%p448_p13)  }
  0x60   : > { %1296 = vmatprep.subr.bf16.mxu0 (!%p448_p13), %v1795_v2  ;;  %v1800_v5 = vld [vmem:[%s2419_s10 + $0x8] ss:$16 sps:$4 sm:$0xff] (!%p448_p13)   ;;  %1378 = vmatprep.subr.bf16.mxu1 (!%p448_p13), %v1797_v3  ;;  %v1801_v6 = vld [vmem:[%s2419_s10 + $0x24] ss:$16 sps:$4 sm:$0xff] (!%p448_p13)   ;;  %v1803_v7 = vld [vmem:[%s2419_s10 + $0x2c] ss:$16 sps:$4 sm:$0xff] (!%p448_p13)  }
  0x61   : > { %1297 = vmatpush1.bf16.msra.mxu0 (!%p448_p13), %v1799_v4  ;;  %1379 = vmatpush1.bf16.msra.mxu1 (!%p448_p13), %v1800_v5  ;;  %v1805_v8 = vld [vmem:[%s2419_s10 + $0x20] ss:$16 sps:$4 sm:$0xff] (!%p448_p13)   ;;  %v1806_v9 = vld [vmem:[%s2419_s10 + $0x28] ss:$16 sps:$4 sm:$0xff] (!%p448_p13)   ;;  %v1807_v10 = vld [vmem:[%s2419_s10 + $0x44] ss:$16 sps:$4 sm:$0xff] (!%p448_p13)  }
  0x62   : > { %1298 = vmatprep.subr.bf16.mxu0 (!%p448_p13), %v1801_v6  ;;  %1380 = vmatprep.subr.bf16.mxu1 (!%p448_p13), %v1803_v7  ;;  %v1809_v11 = vld [vmem:[%s2419_s10 + $0x4c] ss:$16 sps:$4 sm:$0xff] (!%p448_p13)   ;;  %v1811_v12 = vld [vmem:[%s2419_s10 + $0x40] ss:$16 sps:$4 sm:$0xff] (!%p448_p13)   ;;  %v1812_v13 = vld [vmem:[%s2419_s10 + $0x48] ss:$16 sps:$4 sm:$0xff] (!%p448_p13)  }
  0x63   : > { %v1813_v14 = vld [vmem:[%s2419_s10 + $0x64] ss:$16 sps:$4 sm:$0xff] (!%p448_p13)   ;;  %v1815_v15 = vld [vmem:[%s2419_s10 + $0x6c] ss:$16 sps:$4 sm:$0xff] (!%p448_p13)   ;;  %v1817_v16 = vld [vmem:[%s2419_s10 + $0x60] ss:$16 sps:$4 sm:$0xff] (!%p448_p13)  }
  0x64   : > { %v1818_v17 = vld [vmem:[%s2419_s10 + $0x68] ss:$16 sps:$4 sm:$0xff]   ;;  %v1819_v18 = vld [vmem:[%s2419_s10 + $0x84] ss:$16 sps:$4 sm:$0xff]   ;;  %v1821_v19 = vld [vmem:[%s2419_s10 + $0x8c] ss:$16 sps:$4 sm:$0xff]  }
  0x65   : > { %1299 = vmatpush1.bf16.msra.mxu0 %v1805_v8  ;;  %1381 = vmatpush1.bf16.msra.mxu1 %v1806_v9  ;;  %v1823_v20 = vld [vmem:[%s2419_s10 + $0x80] ss:$16 sps:$4 sm:$0xff]   ;;  %v1824_v21 = vld [vmem:[%s2419_s10 + $0x88] ss:$16 sps:$4 sm:$0xff]   ;;  %v1825_v22 = vld [vmem:[%s2419_s10 + $0xa4] ss:$16 sps:$4 sm:$0xff]   ;;  %v502_v8 = vpack.c.bf16 %v498_v0, %v498_v0 }
  0x66   : > { %1300 = vmatprep.subr.bf16.mxu0 %v1807_v10  ;;  %1382 = vmatprep.subr.bf16.mxu1 %v1809_v11  ;;  %v1827_v23 = vld [vmem:[%s2419_s10 + $0xac] ss:$16 sps:$4 sm:$0xff]   ;;  %v1829_v24 = vld [vmem:[%s2419_s10 + $0xa0] ss:$16 sps:$4 sm:$0xff]   ;;  %v1830_v25 = vld [vmem:[%s2419_s10 + $0xa8] ss:$16 sps:$4 sm:$0xff]  }
  0x67   : > { %v1831_v26 = vld [vmem:[%s2419_s10 + $0xc4] ss:$16 sps:$4 sm:$0xff]   ;;  %v1833_v27 = vld [vmem:[%s2419_s10 + $0xcc] ss:$16 sps:$4 sm:$0xff]   ;;  %v1835_v28 = vld [vmem:[%s2419_s10 + $0xc0] ss:$16 sps:$4 sm:$0xff]  }
  0x68   : > { %v1836_v29 = vld [vmem:[%s2419_s10 + $0xc8] ss:$16 sps:$4 sm:$0xff]   ;;  %v1837_v30 = vld [vmem:[%s2419_s10 + $0xe4] ss:$16 sps:$4 sm:$0xff]   ;;  %v1839_v31 = vld [vmem:[%s2419_s10 + $0xec] ss:$16 sps:$4 sm:$0xff]  }
  0x69   : > { %1301 = vmatpush1.bf16.msra.mxu0 %v1811_v12  ;;  %1383 = vmatpush1.bf16.msra.mxu1 %v1812_v13  ;;  %v1841_v32 = vld [vmem:[%s2419_s10 + $0xe0] ss:$16 sps:$4 sm:$0xff]   ;;  %v1842_v33 = vld [vmem:[%s2419_s10 + $0xe8] ss:$16 sps:$4 sm:$0xff]   ;;  %v1843_v34 = vld [vmem:[%s2419_s10 + $0x104] ss:$16 sps:$4 sm:$0xff]  }
  0x6a   : > { %1302 = vmatprep.subr.bf16.mxu0 %v1813_v14  ;;  %1384 = vmatprep.subr.bf16.mxu1 %v1815_v15  ;;  %v1845_v35 = vld [vmem:[%s2419_s10 + $0x10c] ss:$16 sps:$4 sm:$0xff]   ;;  %v1847_v36 = vld [vmem:[%s2419_s10 + $0x100] ss:$16 sps:$4 sm:$0xff]   ;;  %v1848_v37 = vld [vmem:[%s2419_s10 + $0x108] ss:$16 sps:$4 sm:$0xff]  }
  0x6b   : > { %v1849_v38 = vld [vmem:[%s2419_s10 + $0x124] ss:$16 sps:$4 sm:$0xff]   ;;  %v1851_v39 = vld [vmem:[%s2419_s10 + $0x12c] ss:$16 sps:$4 sm:$0xff]   ;;  %v1853_v40 = vld [vmem:[%s2419_s10 + $0x120] ss:$16 sps:$4 sm:$0xff]  }
  0x6c   : > { %v1854_v41 = vld [vmem:[%s2419_s10 + $0x128] ss:$16 sps:$4 sm:$0xff]   ;;  %v1855_v42 = vld [vmem:[%s2419_s10 + $0x144] ss:$16 sps:$4 sm:$0xff]   ;;  %v1857_v43 = vld [vmem:[%s2419_s10 + $0x14c] ss:$16 sps:$4 sm:$0xff]  }
  0x6d   : > { %1303 = vmatpush1.bf16.msra.mxu0 %v1817_v16  ;;  %1385 = vmatpush1.bf16.msra.mxu1 %v1818_v17  ;;  %v1859_v44 = vld [vmem:[%s2419_s10 + $0x140] ss:$16 sps:$4 sm:$0xff]   ;;  %v1860_v45 = vld [vmem:[%s2419_s10 + $0x148] ss:$16 sps:$4 sm:$0xff]   ;;  %v1861_v46 = vld [vmem:[%s2419_s10 + $0x164] ss:$16 sps:$4 sm:$0xff]  }
  0x6e   : > { %1304 = vmatprep.subr.bf16.mxu0 %v1819_v18  ;;  %1386 = vmatprep.subr.bf16.mxu1 %v1821_v19  ;;  %v1863_v47 = vld [vmem:[%s2419_s10 + $0x16c] ss:$16 sps:$4 sm:$0xff]   ;;  %v1865_v48 = vld [vmem:[%s2419_s10 + $0x160] ss:$16 sps:$4 sm:$0xff]   ;;  %v1866_v49 = vld [vmem:[%s2419_s10 + $0x168] ss:$16 sps:$4 sm:$0xff]  }
  0x6f   : > { %v1867_v50 = vld [vmem:[%s2419_s10 + $0x184] ss:$16 sps:$4 sm:$0xff]   ;;  %v1869_v51 = vld [vmem:[%s2419_s10 + $0x18c] ss:$16 sps:$4 sm:$0xff]   ;;  %v1871_v52 = vld [vmem:[%s2419_s10 + $0x180] ss:$16 sps:$4 sm:$0xff]  }
  0x70   : > { %v1872_v53 = vld [vmem:[%s2419_s10 + $0x188] ss:$16 sps:$4 sm:$0xff]   ;;  %v1873_v54 = vld [vmem:[%s2419_s10 + $0x1a4] ss:$16 sps:$4 sm:$0xff]   ;;  %v1875_v55 = vld [vmem:[%s2419_s10 + $0x1ac] ss:$16 sps:$4 sm:$0xff]  }
  0x71   : > { %1305 = vmatpush1.bf16.msra.mxu0 %v1823_v20  ;;  %1387 = vmatpush1.bf16.msra.mxu1 %v1824_v21  ;;  %v1877_v56 = vld [vmem:[%s2419_s10 + $0x1a0] ss:$16 sps:$4 sm:$0xff]   ;;  %v1878_v57 = vld [vmem:[%s2419_s10 + $0x1a8] ss:$16 sps:$4 sm:$0xff]   ;;  %v1879_v58 = vld [vmem:[%s2419_s10 + $0x1c4] ss:$16 sps:$4 sm:$0xff]  }
  0x72   : > { %1306 = vmatprep.subr.bf16.mxu0 %v1825_v22  ;;  %1388 = vmatprep.subr.bf16.mxu1 %v1827_v23  ;;  %v1881_v59 = vld [vmem:[%s2419_s10 + $0x1cc] ss:$16 sps:$4 sm:$0xff]   ;;  %v1883_v60 = vld [vmem:[%s2419_s10 + $0x1c0] ss:$16 sps:$4 sm:$0xff]   ;;  %v1884_v61 = vld [vmem:[%s2419_s10 + $0x1c8] ss:$16 sps:$4 sm:$0xff]  }
  0x73   : > { %v1885_v62 = vld [vmem:[%s2419_s10 + $0x1e4] ss:$16 sps:$4 sm:$0xff]   ;;  %v1887_v63 = vld [vmem:[%s2419_s10 + $0x1ec] ss:$16 sps:$4 sm:$0xff]   ;;  %v1889_v1 = vld [vmem:[%s2419_s10 + $0x1e0] ss:$16 sps:$4 sm:$0xff]  }
  0x74   : > { %v1890_v2 = vld [vmem:[%s2419_s10 + $0x1e8] ss:$16 sps:$4 sm:$0xff]   ;;  %v1893_v3 = vld [vmem:[%s2419_s10 + $0x204] ss:$16 sps:$4 sm:$0xff]   ;;  %v1896_v4 = vld [vmem:[%s2419_s10 + $0x20c] ss:$16 sps:$4 sm:$0xff]  }
  0x75   : > { %1307 = vmatpush1.bf16.msra.mxu0 %v1829_v24  ;;  %1389 = vmatpush1.bf16.msra.mxu1 %v1830_v25  ;;  %v501_v5 = vld [vmem:[%s2616_s0 + $0x18] sm:$0xff]  ;;  %v1891_v6 = vld [vmem:[%s2419_s10 + $0x200] ss:$16 sps:$4 sm:$0xff]   ;;  %v1899_v9 = vld [vmem:[%s2419_s10 + $0x224] ss:$16 sps:$4 sm:$0xff]   ;;  %s2630_s27 = smov (!%p493_p0, %s1592_s27), 7 }
  0x76   : > { %1308 = vmatprep.subr.bf16.mxu0 %v1831_v26  ;;  %1390 = vmatprep.subr.bf16.mxu1 %v1833_v27  ;;  %v1894_v7 = vld [vmem:[%s2419_s10 + $0x208] ss:$16 sps:$4 sm:$0xff]   ;;  %v1902_v10 = vld [vmem:[%s2419_s10 + $0x22c] ss:$16 sps:$4 sm:$0xff]   ;;  %v505_v11 = vpack.c.bf16 %v501_v5, %v501_v5  ;;  %v1897_v12 = vld [vmem:[%s2419_s10 + $0x220] ss:$16 sps:$4 sm:$0xff]   ;;  %s495_s30 = scalar_lea.vmem %s2618_s2, %s2630_s27 }
  0x77   : > { %v1900_v13 = vld [vmem:[%s2419_s10 + $0x228] ss:$16 sps:$4 sm:$0xff]   ;;  %v1905_v14 = vld [vmem:[%s2419_s10 + $0x244] ss:$16 sps:$4 sm:$0xff]   ;;  %v1908_v15 = vld [vmem:[%s2419_s10 + $0x24c] ss:$16 sps:$4 sm:$0xff]  }
  0x78   : > { %v1903_v16 = vld [vmem:[%s2419_s10 + $0x240] ss:$16 sps:$4 sm:$0xff]   ;;  %v1906_v17 = vld [vmem:[%s2419_s10 + $0x248] ss:$16 sps:$4 sm:$0xff]   ;;  %v1911_v18 = vld [vmem:[%s2419_s10 + $0x264] ss:$16 sps:$4 sm:$0xff]  }
  0x79   : > { %1309 = vmatpush1.bf16.msra.mxu0 %v1835_v28  ;;  %1391 = vmatpush1.bf16.msra.mxu1 %v1836_v29  ;;  %v1914_v19 = vld [vmem:[%s2419_s10 + $0x26c] ss:$16 sps:$4 sm:$0xff]   ;;  %v1909_v20 = vld [vmem:[%s2419_s10 + $0x260] ss:$16 sps:$4 sm:$0xff]   ;;  %v1912_v21 = vld [vmem:[%s2419_s10 + $0x268] ss:$16 sps:$4 sm:$0xff]  }
  0x7a   : > { %1310 = vmatprep.subr.bf16.mxu0 %v1837_v30  ;;  %1392 = vmatprep.subr.bf16.mxu1 %v1839_v31  ;;  %v1917_v22 = vld [vmem:[%s2419_s10 + $0x284] ss:$16 sps:$4 sm:$0xff]   ;;  %v1920_v23 = vld [vmem:[%s2419_s10 + $0x28c] ss:$16 sps:$4 sm:$0xff]   ;;  %v1915_v24 = vld [vmem:[%s2419_s10 + $0x280] ss:$16 sps:$4 sm:$0xff]  }
  0x7b   : > { %v1918_v25 = vld [vmem:[%s2419_s10 + $0x288] ss:$16 sps:$4 sm:$0xff]   ;;  %v1923_v26 = vld [vmem:[%s2419_s10 + $0x2a4] ss:$16 sps:$4 sm:$0xff]   ;;  %v1926_v27 = vld [vmem:[%s2419_s10 + $0x2ac] ss:$16 sps:$4 sm:$0xff]  }
  0x7c   : > { %v1921_v28 = vld [vmem:[%s2419_s10 + $0x2a0] ss:$16 sps:$4 sm:$0xff]   ;;  %v1924_v29 = vld [vmem:[%s2419_s10 + $0x2a8] ss:$16 sps:$4 sm:$0xff]   ;;  %v1929_v30 = vld [vmem:[%s2419_s10 + $0x2c4] ss:$16 sps:$4 sm:$0xff]  }
  0x7d   : > { %1311 = vmatpush1.bf16.msra.mxu0 %v1841_v32  ;;  %1393 = vmatpush1.bf16.msra.mxu1 %v1842_v33  ;;  %v1932_v31 = vld [vmem:[%s2419_s10 + $0x2cc] ss:$16 sps:$4 sm:$0xff]   ;;  %v1927_v32 = vld [vmem:[%s2419_s10 + $0x2c0] ss:$16 sps:$4 sm:$0xff]   ;;  %v1930_v33 = vld [vmem:[%s2419_s10 + $0x2c8] ss:$16 sps:$4 sm:$0xff]  }
  0x7e   : > { %1312 = vmatprep.subr.bf16.mxu0 %v1843_v34  ;;  %1394 = vmatprep.subr.bf16.mxu1 %v1845_v35  ;;  %v1935_v34 = vld [vmem:[%s2419_s10 + $0x2e4] ss:$16 sps:$4 sm:$0xff]   ;;  %v1938_v35 = vld [vmem:[%s2419_s10 + $0x2ec] ss:$16 sps:$4 sm:$0xff]   ;;  %v1975_v0 = vld [vmem:[%s2419_s10 + $0x3c0] ss:$16 sps:$4 sm:$0xff]  }
  0x7f   : > { %v1984_v5 = vld [vmem:[%s2419_s10 + $0x3e8] ss:$16 sps:$4 sm:$0xff]   ;;  %s1591_s4 = sshll.u32 %s2413_s6, 5  ;;  %s1727_s5 = sshll.u32 %s2057_s15, 9 }
  0x80   : > { %s485_s7 = scalar_lea.vmem [#allocation3], %s1591_s4  ;;  %s2567_s11 = scalar_lea.hbm %s2619_s3, %s1727_s5 }
  0x81   : > { %1313 = vmatpush1.bf16.msra.mxu0 %v1847_v36  ;;  %1395 = vmatpush1.bf16.msra.mxu1 %v1848_v37  ;;  %v1933_v36 = vld [vmem:[%s2419_s10 + $0x2e0] ss:$16 sps:$4 sm:$0xff]   ;;  %v1936_v37 = vld [vmem:[%s2419_s10 + $0x2e8] ss:$16 sps:$4 sm:$0xff]   ;;  %s1481_s8 = sshll.u32 %s485_s7, 4  ;;  %s1465_s15 = scalar_lea.sflag [#allocation4], %s2413_s6  ;;  %s2569_s8 = int_to_ptr.vmem [resolvable:$true] %s1481_s8 }
  0x82   : > { %1314 = vmatprep.subr.bf16.mxu0 %v1849_v38  ;;  %1396 = vmatprep.subr.bf16.mxu1 %v1851_v39  ;;  %v1941_v38 = vld [vmem:[%s2419_s10 + $0x304] ss:$16 sps:$4 sm:$0xff]   ;;  %v1944_v39 = vld [vmem:[%s2419_s10 + $0x30c] ss:$16 sps:$4 sm:$0xff]   ;;  %s1987_s18 = scalar_lea.vmem %s2569_s8, 512  ;;  %s2067_s19 = smov [#allocation3]  }
  0x83   : > { %p1988_p1 = scmp.ne.s32.totalorder %s2569_s8, %s1987_s18  ;;  %s1991_s21 = sshll.u32 %s2067_s19, 4  ;;  %s1992_s21 = int_to_ptr.vmem [resolvable:$false] %s1991_s21 }
  0x84   : > { %s1993_s23 = scalar_lea.vmem %s1992_s21, 1024  ;;  %p1994_p4 = scmp.lt.s32.totalorder %s2569_s8, %s1992_s21 }
  0x85   : > { %1315 = vmatpush1.bf16.msra.mxu0 %v1853_v40  ;;  %1397 = vmatpush1.bf16.msra.mxu1 %v1854_v41  ;;  %v1939_v40 = vld [vmem:[%s2419_s10 + $0x300] ss:$16 sps:$4 sm:$0xff]   ;;  %v1942_v41 = vld [vmem:[%s2419_s10 + $0x308] ss:$16 sps:$4 sm:$0xff]   ;;  %p1989_p2 = pnand %p1988_p1, %p2127_p5  ;;  %p1995_p6 = scmp.lt.s32.totalorder %s1993_s23, %s1987_s18 }
  0x86   : > { %1316 = vmatprep.subr.bf16.mxu0 %v1855_v42  ;;  %1398 = vmatprep.subr.bf16.mxu1 %v1857_v43  ;;  %v1947_v42 = vld [vmem:[%s2419_s10 + $0x324] ss:$16 sps:$4 sm:$0xff]   ;;  %v1950_v43 = vld [vmem:[%s2419_s10 + $0x32c] ss:$16 sps:$4 sm:$0xff]  }
  0x87   : > { %p1990_p3 = pneg %p1989_p2  ;;  %p1996_p7 = por %p1995_p6, %p1994_p4 }
  0x89   : > { %1317 = vmatpush1.bf16.msra.mxu0 %v1859_v44  ;;  %1399 = vmatpush1.bf16.msra.mxu1 %v1860_v45  ;;  %v1945_v44 = vld [vmem:[%s2419_s10 + $0x320] ss:$16 sps:$4 sm:$0xff]   ;;  %v1948_v45 = vld [vmem:[%s2419_s10 + $0x328] ss:$16 sps:$4 sm:$0xff]   ;;  %p1997_p8 = pnand %p1996_p7, %p1990_p3 }
  0x8a   : > { %1318 = vmatprep.subr.bf16.mxu0 %v1861_v46  ;;  %1400 = vmatprep.subr.bf16.mxu1 %v1863_v47  ;;  %v1953_v46 = vld [vmem:[%s2419_s10 + $0x344] ss:$16 sps:$4 sm:$0xff]   ;;  %v1956_v47 = vld [vmem:[%s2419_s10 + $0x34c] ss:$16 sps:$4 sm:$0xff]  }
  0x8d   : > { %1319 = vmatpush1.bf16.msra.mxu0 %v1865_v48  ;;  %1401 = vmatpush1.bf16.msra.mxu1 %v1866_v49  ;;  %v1951_v48 = vld [vmem:[%s2419_s10 + $0x340] ss:$16 sps:$4 sm:$0xff]   ;;  %v1954_v49 = vld [vmem:[%s2419_s10 + $0x348] ss:$16 sps:$4 sm:$0xff]  }
  0x8e   : > { %1320 = vmatprep.subr.bf16.mxu0 %v1867_v50  ;;  %1402 = vmatprep.subr.bf16.mxu1 %v1869_v51  ;;  %v1959_v50 = vld [vmem:[%s2419_s10 + $0x364] ss:$16 sps:$4 sm:$0xff]   ;;  %v1962_v51 = vld [vmem:[%s2419_s10 + $0x36c] ss:$16 sps:$4 sm:$0xff]  }
  0x91   : > { %1321 = vmatpush1.bf16.msra.mxu0 %v1871_v52  ;;  %1403 = vmatpush1.bf16.msra.mxu1 %v1872_v53  ;;  %v1957_v52 = vld [vmem:[%s2419_s10 + $0x360] ss:$16 sps:$4 sm:$0xff]   ;;  %v1960_v53 = vld [vmem:[%s2419_s10 + $0x368] ss:$16 sps:$4 sm:$0xff]  }
  0x92   : > { %1322 = vmatprep.subr.bf16.mxu0 %v1873_v54  ;;  %1404 = vmatprep.subr.bf16.mxu1 %v1875_v55  ;;  %v1965_v54 = vld [vmem:[%s2419_s10 + $0x384] ss:$16 sps:$4 sm:$0xff]   ;;  %v1968_v55 = vld [vmem:[%s2419_s10 + $0x38c] ss:$16 sps:$4 sm:$0xff]  }
  0x95   : > { %1323 = vmatpush1.bf16.msra.mxu0 %v1877_v56  ;;  %1405 = vmatpush1.bf16.msra.mxu1 %v1878_v57  ;;  %v1963_v56 = vld [vmem:[%s2419_s10 + $0x380] ss:$16 sps:$4 sm:$0xff]   ;;  %v1966_v57 = vld [vmem:[%s2419_s10 + $0x388] ss:$16 sps:$4 sm:$0xff]  }
  0x96   : > { %1324 = vmatprep.subr.bf16.mxu0 %v1879_v58  ;;  %1406 = vmatprep.subr.bf16.mxu1 %v1881_v59  ;;  %v1971_v58 = vld [vmem:[%s2419_s10 + $0x3a4] ss:$16 sps:$4 sm:$0xff]   ;;  %v1974_v59 = vld [vmem:[%s2419_s10 + $0x3ac] ss:$16 sps:$4 sm:$0xff]  }
  0x99   : > { %1325 = vmatpush1.bf16.msra.mxu0 %v1883_v60  ;;  %1407 = vmatpush1.bf16.msra.mxu1 %v1884_v61  ;;  %v1969_v60 = vld [vmem:[%s2419_s10 + $0x3a0] ss:$16 sps:$4 sm:$0xff]   ;;  %v1972_v61 = vld [vmem:[%s2419_s10 + $0x3a8] ss:$16 sps:$4 sm:$0xff]  }
  0x9a   : > { %1326 = vmatprep.subr.bf16.mxu0 %v1885_v62  ;;  %1408 = vmatprep.subr.bf16.mxu1 %v1887_v63  ;;  %v1977_v62 = vld [vmem:[%s2419_s10 + $0x3c4] ss:$16 sps:$4 sm:$0xff]   ;;  %v1980_v63 = vld [vmem:[%s2419_s10 + $0x3cc] ss:$16 sps:$4 sm:$0xff]  }
  0x9d   : > { %1327 = vmatpush1.bf16.msra.mxu0 %v1889_v1  ;;  %1409 = vmatpush1.bf16.msra.mxu1 %v1890_v2  ;;  %v1978_v1 = vld [vmem:[%s2419_s10 + $0x3c8] ss:$16 sps:$4 sm:$0xff]   ;;  %v1983_v2 = vld [vmem:[%s2419_s10 + $0x3e4] ss:$16 sps:$4 sm:$0xff]  }
  0x9e   : > { %1337 = vmatprep.subr.bf16.mxu0 %v1893_v3  ;;  %1419 = vmatprep.subr.bf16.mxu1 %v1896_v4  ;;  %v1986_v3 = vld [vmem:[%s2419_s10 + $0x3ec] ss:$16 sps:$4 sm:$0xff]   ;;  %v1981_v4 = vld [vmem:[%s2419_s10 + $0x3e0] ss:$16 sps:$4 sm:$0xff]  }
  0xa0   : > { %1329 = vmatmul.mubr.bf16.vlgmr.msra.gmra.mrb[0].mxu0 %v502_v8  ;;  %1411 = vmatmul.mubr.bf16.vlgmr.msra.gmra.mrb[0].mxu1 %v502_v8  ;;  %v636_v8 = vlaneseq }
  0xa1   : > { %1338 = vmatpush1.bf16.msra.mxu0 %v1891_v6  ;;  %1420 = vmatpush1.bf16.msra.mxu1 %v1894_v7  ;;  %v500_v6 = vld [vmem:[%s2616_s0 + $0x10] sm:$0xff] }
  0xa2   : > { %1339 = vmatprep.subr.bf16.mxu0 %v1899_v9  ;;  %1421 = vmatprep.subr.bf16.mxu1 %v1902_v10  ;;  %v504_v7 = vpack.c.bf16 %v500_v6, %v500_v6  ;;  %v637_v9 = vshrl.u32 %v636_v8, 7 }
  0xa3   : > { %1369 = vmatprep.mubr.bf16.mxu0 %v505_v11  ;;  %1451 = vmatprep.mubr.bf16.mxu1 %v505_v11 }
  0xa4   : > { %v638_v10 = vsub.s32 0, %v637_v9  ;;  %v646_v11 = vsub.s32 2, %v637_v9 }
  0xa5   : > { %1340 = vmatpush1.bf16.msra.mxu0 %v1897_v12  ;;  %1422 = vmatpush1.bf16.msra.mxu1 %v1900_v13  ;;  %v634_v12 = vld [vmem:[%s495_s30] sm:$0xf]  ;;  %v642_v13 = vsub.s32 1, %v637_v9 }
  0xa6   : > { %1341 = vmatprep.subr.bf16.mxu0 %v1905_v14  ;;  %1423 = vmatprep.subr.bf16.mxu1 %v1908_v15  ;;  %v650_v14 = vsub.s32 3, %v637_v9  ;;  %v639_v15 = vrot.slane %v634_v12, %v638_v10 }
  0xa9   : > { %1342 = vmatpush1.bf16.msra.mxu0 %v1903_v16  ;;  %1424 = vmatpush1.bf16.msra.mxu1 %v1906_v17  ;;  %v647_v16 = vrot.slane %v634_v12, %v646_v11  ;;  %v643_v17 = vrot.slane %v634_v12, %v642_v13 }
  0xaa   : > { %1343 = vmatprep.subr.bf16.mxu0 %v1911_v18  ;;  %1425 = vmatprep.subr.bf16.mxu1 %v1914_v19  ;;  %v651_v18 = vrot.slane %v634_v12, %v650_v14 }
  0xad   : > { %1344 = vmatpush1.bf16.msra.mxu0 %v1909_v20  ;;  %1426 = vmatpush1.bf16.msra.mxu1 %v1912_v21 }
  0xae   : > { %1345 = vmatprep.subr.bf16.mxu0 %v1917_v22  ;;  %1427 = vmatprep.subr.bf16.mxu1 %v1920_v23 }
  0xb1   : > { %1346 = vmatpush1.bf16.msra.mxu0 %v1915_v24  ;;  %1428 = vmatpush1.bf16.msra.mxu1 %v1918_v25 }
  0xb2   : > { %1347 = vmatprep.subr.bf16.mxu0 %v1923_v26  ;;  %1429 = vmatprep.subr.bf16.mxu1 %v1926_v27 }
  0xb5   : > { %1348 = vmatpush1.bf16.msra.mxu0 %v1921_v28  ;;  %1430 = vmatpush1.bf16.msra.mxu1 %v1924_v29 }
  0xb6   : > { %1349 = vmatprep.subr.bf16.mxu0 %v1929_v30  ;;  %1431 = vmatprep.subr.bf16.mxu1 %v1932_v31 }
  0xb9   : > { %1350 = vmatpush1.bf16.msra.mxu0 %v1927_v32  ;;  %1432 = vmatpush1.bf16.msra.mxu1 %v1930_v33 }
  0xba   : > { %1351 = vmatprep.subr.bf16.mxu0 %v1935_v34  ;;  %1433 = vmatprep.subr.bf16.mxu1 %v1938_v35 }
  0xbd   : > { %1352 = vmatpush1.bf16.msra.mxu0 %v1933_v36  ;;  %1434 = vmatpush1.bf16.msra.mxu1 %v1936_v37 }
  0xbe   : > { %1353 = vmatprep.subr.bf16.mxu0 %v1941_v38  ;;  %1435 = vmatprep.subr.bf16.mxu1 %v1944_v39 }
  0xc1   : > { %1354 = vmatpush1.bf16.msra.mxu0 %v1939_v40  ;;  %1436 = vmatpush1.bf16.msra.mxu1 %v1942_v41 }
  0xc2   : > { %1355 = vmatprep.subr.bf16.mxu0 %v1947_v42  ;;  %1437 = vmatprep.subr.bf16.mxu1 %v1950_v43 }
  0xc5   : > { %1356 = vmatpush1.bf16.msra.mxu0 %v1945_v44  ;;  %1438 = vmatpush1.bf16.msra.mxu1 %v1948_v45 }
  0xc6   : > { %1357 = vmatprep.subr.bf16.mxu0 %v1953_v46  ;;  %1439 = vmatprep.subr.bf16.mxu1 %v1956_v47 }
  0xc9   : > { %1358 = vmatpush1.bf16.msra.mxu0 %v1951_v48  ;;  %1440 = vmatpush1.bf16.msra.mxu1 %v1954_v49 }
  0xca   : > { %1359 = vmatprep.subr.bf16.mxu0 %v1959_v50  ;;  %1441 = vmatprep.subr.bf16.mxu1 %v1962_v51 }
  0xcd   : > { %1360 = vmatpush1.bf16.msra.mxu0 %v1957_v52  ;;  %1442 = vmatpush1.bf16.msra.mxu1 %v1960_v53 }
  0xce   : > { %1361 = vmatprep.subr.bf16.mxu0 %v1965_v54  ;;  %1443 = vmatprep.subr.bf16.mxu1 %v1968_v55 }
  0xd1   : > { %1362 = vmatpush1.bf16.msra.mxu0 %v1963_v56  ;;  %1444 = vmatpush1.bf16.msra.mxu1 %v1966_v57 }
  0xd2   : > { %1363 = vmatprep.subr.bf16.mxu0 %v1971_v58  ;;  %1445 = vmatprep.subr.bf16.mxu1 %v1974_v59 }
  0xd5   : > { %1364 = vmatpush1.bf16.msra.mxu0 %v1969_v60  ;;  %1446 = vmatpush1.bf16.msra.mxu1 %v1972_v61 }
  0xd6   : > { %1365 = vmatprep.subr.bf16.mxu0 %v1977_v62  ;;  %1447 = vmatprep.subr.bf16.mxu1 %v1980_v63 }
  0xd9   : > { %1366 = vmatpush1.bf16.msra.mxu0 %v1975_v0  ;;  %1448 = vmatpush1.bf16.msra.mxu1 %v1978_v1 }
  0xda   : > { %1367 = vmatprep.subr.bf16.mxu0 %v1983_v2  ;;  %1449 = vmatprep.subr.bf16.mxu1 %v1986_v3 }
  0xdd   : > { %1368 = vmatpush1.bf16.msra.mxu0 %v1981_v4  ;;  %1450 = vmatpush1.bf16.msra.mxu1 %v1984_v5 }
  0xe0   : > { %1370 = vmatmul.mubr.bf16.vlgmr.msra.gmra.mrb[0].mxu0 %v504_v7  ;;  %1452 = vmatmul.mubr.bf16.vlgmr.msra.gmra.mrb[0].mxu1 %v504_v7 }
 0x1b3   : > { %v1371_v19 = vpop.f32.mrb[0].mxu0  ;;  %v1453_v20 = vpop.f32.mrb[0].mxu1 }
 0x1b4   : > { %v1728_v21 = vadd.f32 %v1371_v19, %v639_v15  ;;  %v1730_v22 = vadd.f32 %v1453_v20, %v647_v16  ;;  %v1373_v23 = vpop.f32.mrb[1].mxu0  ;;  %v1455_v24 = vpop.f32.mrb[1].mxu1 }
 0x1b5   : > { %v1729_v25 = vadd.f32 %v1373_v23, %v643_v17  ;;  %v1731_v26 = vadd.f32 %v1455_v24, %v651_v18  ;;  %v1375_v27 = vpop.f32.mrb[2].mxu0  ;;  %v1457_v28 = vpop.f32.mrb[2].mxu1 }
 0x1b6   : > { %1460 = vst [vmem:[%s485_s7] sm:$0xff] %v1728_v21  ;;  %1462 = vst [vmem:[%s485_s7 + $0x10] sm:$0xff] %v1730_v22  ;;  %v1376_v29 = vpop.f32.mrb[3].mxu0  ;;  %v1458_v30 = vpop.f32.mrb[3].mxu1 }
 0x1b7   : > { %1461 = vst [vmem:[%s485_s7 + $0x8] sm:$0xff] %v1729_v25  ;;  %1463 = vst [vmem:[%s485_s7 + $0x18] sm:$0xff] %v1731_v26 }
 0x1b8   : > { %2000 = shalt.err (!%p1997_p8)
}
 0x1b9   : > { %s2001_s6 = scalar_lea.hbm %s2567_s11, 512  ;;  %s2005_s28 = scalar_lea.hbm %s2619_s3, 1024 }
 0x1ba   : > { %p2002_p11 = scmp.ne.s32.totalorder %s2567_s11, %s2001_s6  ;;  %p2006_p0 = scmp.lt.u32.totalorder %s2567_s11, %s2619_s3 }
 0x1bb   : > { %p2007_p1 = scmp.lt.u32.totalorder %s2005_s28, %s2001_s6  ;;  %p2009_p3 = scmp.lt.u32.totalorder %s2001_s6, %s2567_s11 }
 0x1bc   : > { %p2003_p12 = pnand %p2002_p11, %p2127_p5 }
 0x1bd   : > { %p2008_p2 = por %p2007_p1, %p2006_p0 }
 0x1be   : > { %p2004_p13 = pneg %p2003_p12 }
 0x1bf   : > { %p2010_p4 = por %p2009_p3, %p2008_p2 }
 0x1c1   : > { %p2011_p6 = pnand %p2010_p4, %p2004_p13 }
 0x1c3   : > { %2014 = shalt.err (!%p2011_p6)
}
 0x1c4   : > { %1740 = dma.vmem_to_hbm [thread:$0]  (%p2127_p5), %s2569_s8, 512, %s2567_s11, %s1465_s15  }
 0x1c5 PF: > { %s1493_s4 = sand.u32 1, %s2045_s12   ;;  %p1743_p7 = pnand %p1585_p10, %p2138_p9 }
 0x1c6   : > { %s1494_s5 = scalar_lea.sflag [#allocation4], %s1493_s4 }
 0x1c7   : > { %2040 = dma.done.wait (!%p1743_p7), %s1494_s5, 512  }
 0x1c8   : > { %2042 = vsyncadd (!%p1743_p7), %s1494_s5, 4294966784  ;;  %s16_s17 = sadd.s32 1, %s2065_s17   ;;  %s2622_s12 = smov %s2049_s13 }
 0x1c9   : > { %p13_p8 = scmp.ge.s32.totalorder %s16_s17, 4   ;;  %s2623_s13 = smov %s2053_s14 }
 0x1ca   : > { %s2624_s14 = smov %s2136_s24  ;;  %s2625_s15 = smov %s2061_s16 }
 0x1cb   : > { %s2626_s16 = smov %s2628_s20  ;;  %15 = sbr.rel (!%p13_p8) target bundleno = 4 (0x4), region = 101 }
 0x1d2   :  { %1499 = vsyncpa [#allocation4], 1 }
 0x1d3   :  { %1501 = vsyncpa [#allocation4 + $0x1], 1 }

</bundles_post_ra>
